<compile_context>
chip_gen: v7x
topology: tpu7x:2x2x1
jax: 0.10.0
libtpu: 0.0.40
codegen_flags: <defaults>
</compile_context>

<pallas_src>
import functools

import jax
import jax.numpy as jnp
from jax.experimental import pallas as pl
from jax.experimental.pallas import tpu as pltpu


def _pose_loss_kernel(pred_ref, target_ref, out_ref, *,
                      n_height, inv_n_height, inv_n_angle, coef_height):
    # pred_ref / target_ref: (1, n_height + n_angle) lane-dense f32 rows.
    d = pred_ref[...] - target_ref[...]
    sq = d * d

    # Two static lane slices -> two cross-lane (XLU) reductions, keepdims so
    # everything stays a (1, 1) tile.
    sse_h = jnp.sum(sq[:, :n_height], axis=1, keepdims=True)   # (1, 1)
    sse_a = jnp.sum(sq[:, n_height:], axis=1, keepdims=True)   # (1, 1)

    # Normalization + height weight folded into multiply constants (no vdiv).
    loss_h = sse_h * inv_n_height                 # mean over height elements
    loss_a = sse_a * inv_n_angle                  # mean over angle elements
    loss_p = loss_a + sse_h * coef_height         # == loss_a + loss_h * weight

    # Single (1, 3) output tile: lane 0 = pose, lane 1 = height, lane 2 = angle.
    lane = jax.lax.broadcasted_iota(jnp.int32, (1, 3), 1)
    out_ref[...] = jnp.where(lane == 0, loss_p,
                             jnp.where(lane == 1, loss_h, loss_a))


def pose_loss(pred_height, pred_angle, target_height, target_angle,
              height_loss_weight):
    """Returns {'pose', 'pose-height', 'pose-angle'} as scalar f32 arrays."""
    assert pred_height.shape == target_height.shape
    assert pred_angle.shape == target_angle.shape

    pred_height = pred_height.astype(jnp.float32)
    pred_angle = pred_angle.astype(jnp.float32)
    target_height = target_height.astype(jnp.float32)
    target_angle = target_angle.astype(jnp.float32)

    n_height = pred_height.size
    n_angle = pred_angle.size
    n_total = n_height + n_angle

    # Lane-dense packing: one (1, n_total) row per operand, height lanes first.
    pred = jnp.concatenate([pred_height.reshape(1, n_height),
                            pred_angle.reshape(1, n_angle)], axis=1)
    target = jnp.concatenate([target_height.reshape(1, n_height),
                              target_angle.reshape(1, n_angle)], axis=1)

    w = float(height_loss_weight)
    kernel = functools.partial(
        _pose_loss_kernel,
        n_height=n_height,
        inv_n_height=float(1.0 / n_height),
        inv_n_angle=float(1.0 / n_angle),
        coef_height=float(w / n_height),
    )

    out = pl.pallas_call(
        kernel,
        out_shape=jax.ShapeDtypeStruct((1, 3), jnp.float32),
        in_specs=[
            pl.BlockSpec(memory_space=pltpu.MemorySpace.VMEM),
            pl.BlockSpec(memory_space=pltpu.MemorySpace.VMEM),
        ],
        out_specs=pl.BlockSpec(memory_space=pltpu.MemorySpace.VMEM),
        cost_estimate=pl.CostEstimate(
            flops=3 * n_total + 8,
            transcendentals=0,
            bytes_accessed=2 * n_total * 4 + 3 * 4,
        ),
    )(pred, target)

    return {
        'pose': out[0, 0],
        'pose-height': out[0, 1],
        'pose-angle': out[0, 2],
    }


def pose_loss_ref(pred_height, pred_angle, target_height, target_angle,
                  height_loss_weight):
    loss_h = jnp.mean((pred_height - target_height) ** 2)
    loss_a = jnp.mean((pred_angle - target_angle) ** 2)
    return {
        'pose': loss_a + loss_h * height_loss_weight,
        'pose-height': loss_h,
        'pose-angle': loss_a,
    }


if __name__ == "__main__":
    key = jax.random.PRNGKey(0)
    k1, k2, k3, k4 = jax.random.split(key, 4)

    B = 8
    height_loss_weight = 0.5  # constructor argument of PoseLoss

    pred_height = jax.random.normal(k1, (B, 1), dtype=jnp.float32)
    target_height = jax.random.normal(k2, (B, 1), dtype=jnp.float32)
    pred_angle = jax.random.normal(k3, (B, 2), dtype=jnp.float32)
    target_angle = jax.random.normal(k4, (B, 2), dtype=jnp.float32)

    out = pose_loss(pred_height, pred_angle, target_height, target_angle,
                    height_loss_weight)
    out = jax.tree_util.tree_map(jax.block_until_ready, out)

    ref = pose_loss_ref(pred_height, pred_angle, target_height, target_angle,
                        height_loss_weight)

    for k in ('pose', 'pose-height', 'pose-angle'):
        assert jnp.allclose(out[k], ref[k], rtol=1e-5, atol=1e-6), (
            k, out[k], ref[k])

    print("KERNEL_OK")
</pallas_src>

<mosaic_0001>
module attributes {stable_mosaic.version = 11 : i64} {
  func.func @_pose_loss_kernel(%arg0: memref<1x24xf32, #tpu.memory_space<vmem>>, %arg1: memref<1x24xf32, #tpu.memory_space<vmem>>, %arg2: memref<1x3xf32, #tpu.memory_space<vmem>>) attributes {dimension_semantics = [], scalar_prefetch = 0 : i64, scratch_operands = 0 : i64, tpu.core_type = #tpu.core_type<tc>} {
    %c0 = arith.constant 0 : index
    %c0_0 = arith.constant 0 : index
    %0 = vector.load %arg0[%c0, %c0_0] : memref<1x24xf32, #tpu.memory_space<vmem>>, vector<1x24xf32>
    %c0_1 = arith.constant 0 : index
    %c0_2 = arith.constant 0 : index
    %1 = vector.load %arg1[%c0_1, %c0_2] : memref<1x24xf32, #tpu.memory_space<vmem>>, vector<1x24xf32>
    %2 = arith.subf %0, %1 : vector<1x24xf32>
    %3 = arith.mulf %2, %2 : vector<1x24xf32>
    %4 = vector.extract_strided_slice %3 {offsets = [0, 0], sizes = [1, 8], strides = [1, 1]} : vector<1x24xf32> to vector<1x8xf32>
    %cst = arith.constant dense<0.000000e+00> : vector<1xf32>
    %5 = vector.multi_reduction <add>, %4, %cst [1] : vector<1x8xf32> to vector<1xf32>
    %6 = vector.shape_cast %5 : vector<1xf32> to vector<1x1xf32>
    %7 = vector.extract_strided_slice %3 {offsets = [0, 8], sizes = [1, 16], strides = [1, 1]} : vector<1x24xf32> to vector<1x16xf32>
    %cst_3 = arith.constant dense<0.000000e+00> : vector<1xf32>
    %8 = vector.multi_reduction <add>, %7, %cst_3 [1] : vector<1x16xf32> to vector<1xf32>
    %9 = vector.shape_cast %8 : vector<1xf32> to vector<1x1xf32>
    %cst_4 = arith.constant 1.250000e-01 : f32
    %10 = vector.broadcast %cst_4 : f32 to vector<1x1xf32>
    %11 = arith.mulf %6, %10 : vector<1x1xf32>
    %cst_5 = arith.constant 6.250000e-02 : f32
    %12 = vector.broadcast %cst_5 : f32 to vector<1x1xf32>
    %13 = arith.mulf %9, %12 : vector<1x1xf32>
    %cst_6 = arith.constant 6.250000e-02 : f32
    %14 = vector.broadcast %cst_6 : f32 to vector<1x1xf32>
    %15 = arith.mulf %6, %14 : vector<1x1xf32>
    %16 = arith.addf %13, %15 : vector<1x1xf32>
    %17 = tpu.iota {dimensions = array<i32: 1>} : vector<1x3xi32>
    %c0_i32 = arith.constant 0 : i32
    %18 = vector.broadcast %c0_i32 : i32 to vector<1x3xi32>
    %19 = arith.cmpi eq, %17, %18 : vector<1x3xi32>
    %c1_i32 = arith.constant 1 : i32
    %20 = vector.broadcast %c1_i32 : i32 to vector<1x3xi32>
    %21 = arith.cmpi eq, %17, %20 : vector<1x3xi32>
    %22 = vector.shape_cast %11 : vector<1x1xf32> to vector<1x1xf32>
    %23 = vector.broadcast %22 : vector<1x1xf32> to vector<1x3xf32>
    %24 = vector.shape_cast %13 : vector<1x1xf32> to vector<1x1xf32>
    %25 = vector.broadcast %24 : vector<1x1xf32> to vector<1x3xf32>
    %26 = arith.select %21, %23, %25 : vector<1x3xi1>, vector<1x3xf32>
    %27 = vector.shape_cast %16 : vector<1x1xf32> to vector<1x1xf32>
    %28 = vector.broadcast %27 : vector<1x1xf32> to vector<1x3xf32>
    %29 = arith.select %19, %28, %26 : vector<1x3xi1>, vector<1x3xf32>
    %c0_7 = arith.constant 0 : index
    %c0_8 = arith.constant 0 : index
    %30 = vector.load %arg2[%c0_7, %c0_8] : memref<1x3xf32, #tpu.memory_space<vmem>>, vector<1x3xf32>
    tpu.vector_store %arg2[%c0_7, %c0_8], %29 {strides = array<i32>} : memref<1x3xf32, #tpu.memory_space<vmem>>, vector<1x3xf32>,
    return
  }
}

</mosaic_0001>

<bundles_post_ra>
// kernel: tpu_custom_call.1
= control target key start
LH: loop header
LB: loop body
LE: loop exit
PB: predicated region body
PF: predicated region fallthrough
CT: control target
= control target key end

     0   :  { %7 = vsyncpa [#allocation3], 0  ;;  %s167_s0 = inlined_call_operand.hbm [shape: f32[1,24], index: 0, kind: input, shape index: {}]   ;;  %s168_s1 = inlined_call_operand.vmem [shape: f32[1,24], index: 1, kind: input, shape index: {}]   ;;  %s169_s2 = inlined_call_operand.hbm [shape: f32[1,3], index: 2, kind: output, shape index: {}]  }
   0x1   :  { %8 = vsyncpa [#allocation4], 0  ;;  %s122_s9 = smov [#allocation2]   ;;  %s74_s13 = scalar_lea.hbm %s167_s0, 16 }
   0x2   :  { %s15_s10 = sshll.u32 %s122_s9, 4  ;;  %p75_p0 = scmp.ne.s32.totalorder %s167_s0, %s74_s13  ;;  %s16_s10 = int_to_ptr.vmem [resolvable:$true] %s15_s10 }
   0x3   :  { %p78_p1 = scmp.lt.u32.totalorder %s74_s13, %s167_s0 }
   0x5   :  { %p80_p2 = pnand %p78_p1, %p75_p0 }
   0x7   :  { %83 = shalt.err (!%p80_p2)
}
   0x8   :  { %s84_s18 = scalar_lea.vmem %s16_s10, 16  ;;  %s88_s19 = scalar_lea.vmem %s16_s10, 32 }
   0x9   :  { %p85_p3 = scmp.ne.s32.totalorder %s16_s10, %s84_s18  ;;  %p89_p4 = scmp.lt.s32.totalorder %s16_s10, %s16_s10 }
   0xa   :  { %p90_p5 = scmp.lt.s32.totalorder %s88_s19, %s84_s18 }
   0xc   :  { %p91_p6 = por %p90_p5, %p89_p4 }
   0xe   :  { %p92_p7 = pnand %p91_p6, %p85_p3 }
  0x10   :  { %95 = shalt.err (!%p92_p7)
}
  0x11   :  { %18 = dma.hbm_to_vmem [thread:$0]  %s167_s0, 16, %s16_s10, [#allocation3]  }
  0x12   :  { %118 = dma.done.wait [#allocation3], 16  }
  0x13   :  { %119 = vsyncadd [#allocation3], 4294967280  ;;  %v33_v0 = vlaneseq  ;;  %v24_v2 = vld [vmem:[#allocation2] sm:$0x1]  ;;  %s123_s24 = smov 120   ;;  %vm28_vm0 = vcmask 57344  }
  0x14   :  { %v25_v3 = vld [vmem:[%s168_s1] sm:$0x1]  ;;  %vm40_vm1 = vcmask 122880   ;;  %s124_s0 = smov [#allocation5]   ;;  %vm54_vm4 = vcmask 16384  }
  0x15   :  { %v34_v1 = vshrl.u32 %v33_v0, 7  ;;  %v26_v4 = vsub.f32 %v24_v2, %v25_v3  ;;  %v49_v11 = vand.u32 127, %v33_v0  ;;  %s62_s1 = sshll.u32 %s124_s0, 4  ;;  %s63_s1 = int_to_ptr.vmem [resolvable:$true] %s62_s1 }
  0x16   :  { %s96_s25 = scalar_lea.vmem %s63_s1, 16  ;;  %s100_s26 = scalar_lea.vmem %s63_s1, 32 }
  0x17   :  { %v35_v5 = vsub.s32 0, %v34_v1  ;;  %v27_v6 = vmul.f32 %v26_v4, %v26_v4  ;;  %vm51_vm2 = vcmp.eq.s32.totalorder %v49_v11, 1  ;;  %vm50_vm3 = vcmp.eq.s32.totalorder %v49_v11, 0  ;;  %p97_p8 = scmp.ne.s32.totalorder %s63_s1, %s96_s25  ;;  %p101_p9 = scmp.lt.s32.totalorder %s63_s1, %s63_s1 }
  0x18   :  { %p102_p10 = scmp.lt.s32.totalorder %s100_s26, %s96_s25 }
  0x19   :  { %v36_v7 = vrot.slane %v27_v6, %v35_v5  ;;  %v29_v8 = vsel %vm28_vm0, %v27_v6, 0.0 }
  0x1a   :  { %p103_p11 = por %p102_p10, %p101_p9 }
  0x1b   :  { %37 = vrot.lane.b32.xlu0 %v36_v7, %s123_s24 }
  0x1c   :  { %p104_p12 = pnand %p103_p11, %p97_p8 }
  0x3a   :  { %30 = vadd.xlane.f32.xlu0 %v29_v8 }
  0x8d   :  { %v38_v9 = vpop.permute.xlu0 %37 }
  0x8e   :  { %v41_v10 = vsel %vm40_vm1, %v38_v9, 0.0 }
  0x8f   :  { %42 = vadd.xlane.f32.xlu1 %v41_v10 }
  0xc7   :  { %v31_v12 = vpop.xlane.xlu0 %30 }
  0xc8   :  { %v44_v13 = vmul.f32 0.125, %v31_v12  ;;  %v46_v14 = vmul.f32 0.0625, %v31_v12 }
 0x11c   :  { %v43_v15 = vpop.xlane.xlu1 %42 }
 0x11d   :  { %v45_v16 = vmul.f32 0.0625, %v43_v15 }
 0x11f   :  { %v47_v17 = vadd.f32 %v46_v14, %v45_v16  ;;  %v52_v18 = vsel %vm51_vm2, %v44_v13, %v45_v16 }
 0x121   :  { %v53_v19 = vsel %vm50_vm3, %v47_v17, %v52_v18 }
 0x122   :  { %55 = vst.msk [vmem:[#allocation5] sm:$0x1] %vm54_vm4, %v53_v19 }
 0x123   :  { %107 = shalt.err (!%p104_p12)
}
 0x124   :  { %s108_s29 = scalar_lea.hbm %s169_s2, 16 }
 0x125   :  { %p109_p13 = scmp.ne.s32.totalorder %s169_s2, %s108_s29  ;;  %p112_p0 = scmp.lt.u32.totalorder %s108_s29, %s169_s2 }
 0x127   :  { %p114_p1 = pnand %p112_p0, %p109_p13 }
 0x129   :  { %117 = shalt.err (!%p114_p1)
}
 0x12a   :  { %65 = dma.vmem_to_hbm [thread:$0]  %s63_s1, 16, %s169_s2, [#allocation4]  }
 0x12b   :  { %120 = dma.done.wait [#allocation4], 16  }
 0x12c   :  { %121 = vsyncadd [#allocation4], 4294967280 }
 0x12d   :  { %69 = vsyncpa [#allocation3], 1 }
 0x12e   :  { %70 = vsyncpa [#allocation4], 1 }

</bundles_post_ra>
